<compile_context>
chip_gen: v7x
topology: tpu7x:2x2x1
jax: 0.10.0
libtpu: 0.0.40
codegen_flags: <defaults>
</compile_context>

<pallas_src>
import functools

import jax
import jax.numpy as jnp
from jax.experimental import pallas as pl
from jax.experimental.pallas import tpu as pltpu

EPS = 1e-5


def _round_up(n, m):
    return (n + m - 1) // m * m


def _network_dos_kernel(
    x_ref,      # [S, TB]    transposed input tile (zero-padded past column B)
    w1_ref,     # [H, S]     layer1 weight with bn0 gamma folded in
    vec_ref,    # [H, 4]     col0 = b1 (bn0 beta folded), col1 = w3 (bn2 gamma
                #            folded), [0, 2] = b3 (bn2 beta folded), col3 pad
    o_ref,      # [1, B_pad] resident output block (lane-dense, written pass 2)
    sx_ref,     # [S, 1]  running sum of (x - pilot_x)
    sxx_ref,    # [S, 1]  running sum of (x - pilot_x)^2
    px_ref,     # [S, 1]  pilot_x = x of batch element 0
    sh_ref,     # [H, 1]  running sum of (h - pilot_h)
    shh_ref,    # [H, 1]  running sum of (h - pilot_h)^2
    ph_ref,     # [H, 1]  pilot_h = hidden activation of batch element 0
    s0_ref,     # [S, 1]  rsqrt(var0 + eps)
    b1p_ref,    # [H, 1]  b1 with bn0 mean folded in
    c_ref,      # [H, 1]  w3 * rsqrt(var2 + eps)
    d_ref,      # [1, 1]  b3 - sum(mu2 * c)
    *,
    batch, tile, nbt, valid_last, has_pad,
):
    p = pl.program_id(0)      # pass: 0 = x stats, 1 = h stats, 2 = output
    i = pl.program_id(1)      # batch-tile index
    last = nbt - 1
    inv_b = 1.0 / float(batch)

    def hidden():
        # bn0 (scale applied to x, mean folded into bias) + layer1 + LeakyReLU
        xs = x_ref[...] * s0_ref[...]                     # [S, TB]
        hp = (jnp.dot(w1_ref[...], xs, preferred_element_type=jnp.float32)
              + b1p_ref[...])                             # [H, TB]
        return jnp.maximum(hp, 0.5 * hp)                  # LeakyReLU(0.5)

    def accum(sum_ref, sq_ref, d):
        sum_ref[...] += jnp.sum(d, axis=1, keepdims=True)
        sq_ref[...] += jnp.sum(d * d, axis=1, keepdims=True)

    def accum_pad_aware(sum_ref, sq_ref, d):
        # Only the last tile may contain padded columns; all other tiles
        # accumulate unmasked.  Mask is a (1, tile) row (cheap broadcast).
        if not has_pad:
            accum(sum_ref, sq_ref, d)
        else:
            @pl.when(i != last)
            def _():
                accum(sum_ref, sq_ref, d)

            @pl.when(i == last)
            def _():
                m = jax.lax.broadcasted_iota(jnp.int32, (1, tile), 1) < valid_last
                dm = jnp.where(m, d, 0.0)
                accum(sum_ref, sq_ref, dm)

    @pl.when(p == 0)
    def _pass_x_stats():
        @pl.when(i == 0)
        def _init():
            sx_ref[...] = jnp.zeros_like(sx_ref)
            sxx_ref[...] = jnp.zeros_like(sxx_ref)
            sh_ref[...] = jnp.zeros_like(sh_ref)
            shh_ref[...] = jnp.zeros_like(shh_ref)
            px_ref[...] = x_ref[:, 0:1]                   # pilot for shift
        dx = x_ref[...] - px_ref[...]
        accum_pad_aware(sx_ref, sxx_ref, dx)

    @pl.when(p == 1)
    def _pass_h_stats():
        @pl.when(i == 0)
        def _fold_bn0():
            m = sx_ref[...] * inv_b
            mu0 = px_ref[...] + m                         # exact batch mean
            var0 = jnp.maximum(sxx_ref[...] * inv_b - m * m, 0.0)
            s0 = jax.lax.rsqrt(var0 + EPS)                # [S, 1]
            s0_ref[...] = s0
            b1p_ref[...] = vec_ref[:, 0:1] - jnp.dot(
                w1_ref[...], mu0 * s0, preferred_element_type=jnp.float32)
            # Hidden pilot = hidden activation of batch element 0.
            hp0 = jnp.dot(w1_ref[...], px_ref[...] * s0,
                          preferred_element_type=jnp.float32) + b1p_ref[...]
            ph_ref[...] = jnp.maximum(hp0, 0.5 * hp0)
        dh = hidden() - ph_ref[...]
        accum_pad_aware(sh_ref, shh_ref, dh)

    @pl.when(p == 2)
    def _pass_output():
        @pl.when(i == 0)
        def _fold_bn2():
            m = sh_ref[...] * inv_b
            mu2 = ph_ref[...] + m
            var2 = jnp.maximum(shh_ref[...] * inv_b - m * m, 0.0)
            c = vec_ref[:, 1:2] * jax.lax.rsqrt(var2 + EPS)   # [H, 1]
            c_ref[...] = c
            d_ref[...] = vec_ref[0:1, 2:3] - jnp.sum(mu2 * c, axis=0,
                                                     keepdims=True)
        # layer3 with bn2 folded: out = sum_h(h * c) + d, then sigmoid.
        out = jnp.sum(hidden() * c_ref[...], axis=0, keepdims=True) + d_ref[...]
        out = jax.nn.sigmoid(out)                          # [1, TB]
        if has_pad:
            col = jax.lax.broadcasted_iota(jnp.int32, (1, tile), 1) + i * tile
            out = jnp.where(col < batch, out, 0.0)         # keep padding clean
        off = pl.multiple_of(i * tile, 128)
        o_ref[:, pl.ds(off, tile)] = out.astype(o_ref.dtype)


def fold_params(raw):
    """Fold BN affine params into the adjacent Linear layers (host-side, once)."""
    w1 = raw["w1"].astype(jnp.float32)                       # [H, S]
    w1f = w1 * raw["bn0_gamma"][None, :]                     # bn0 gamma -> W1
    b1f = raw["b1"] + w1 @ raw["bn0_beta"]                   # bn0 beta  -> b1
    w3f = (raw["w3"] * raw["bn2_gamma"])[0]                  # bn2 gamma -> w3, [H]
    b3f = raw["b3"] + raw["w3"] @ raw["bn2_beta"]            # bn2 beta  -> b3, [1]
    hdim = w1.shape[0]
    vecs = jnp.zeros((hdim, 4), jnp.float32)
    vecs = vecs.at[:, 0].set(b1f)
    vecs = vecs.at[:, 1].set(w3f)
    vecs = vecs.at[0, 2].set(b3f[0])
    return {"w1f": w1f, "vecs": vecs}


def network_dos_forward(x, folded, *, max_tile=8192):
    """x: [B, nb_stocks] float32.  folded: output of fold_params().  Returns [B, 1]."""
    B, S = x.shape
    H = folded["w1f"].shape[0]

    # Large lane-dense batch tile (sweep 4096-16384; 8192 is safe on v5e/v6e
    # and within the v7x 64 MiB VMEM budget at this S/H).
    tb = min(max_tile, _round_up(max(B, 1), 128))
    b_pad = _round_up(B, tb)
    nbt = b_pad // tb
    has_pad = b_pad != B
    valid_last = B - (nbt - 1) * tb          # valid columns in the last tile

    # Transposed, zero-padded input: [S, B_pad] (batch on the lane axis).
    x_t = jnp.pad(x.astype(jnp.float32).T, ((0, 0), (0, b_pad - B)))

    kernel = functools.partial(
        _network_dos_kernel, batch=B, tile=tb, nbt=nbt,
        valid_last=valid_last, has_pad=has_pad)

    # Two hidden-matmul recomputes + streamed elementwise work; x read 3x,
    # output written once, weights resident.
    flops = 4 * B * S * H + 12 * B * H + 8 * B * S
    bytes_accessed = 4 * (3 * S * b_pad + b_pad + H * S + 4 * H)

    out = pl.pallas_call(
        kernel,
        out_shape=jax.ShapeDtypeStruct((1, b_pad), jnp.float32),
        grid_spec=pltpu.PrefetchScalarGridSpec(
            num_scalar_prefetch=0,
            grid=(3, nbt),
            in_specs=[
                pl.BlockSpec((S, tb), lambda p, i: (0, i)),   # x tile
                pl.BlockSpec((H, S), lambda p, i: (0, 0)),    # folded W1 (resident)
                pl.BlockSpec((H, 4), lambda p, i: (0, 0)),    # packed vectors (resident)
            ],
            # Single resident output block: no HBM writeback until the grid ends.
            out_specs=pl.BlockSpec((1, b_pad), lambda p, i: (0, 0)),
            scratch_shapes=[
                pltpu.VMEM((S, 1), jnp.float32),   # sum(x - pilot_x)
                pltpu.VMEM((S, 1), jnp.float32),   # sum((x - pilot_x)^2)
                pltpu.VMEM((S, 1), jnp.float32),   # pilot_x
                pltpu.VMEM((H, 1), jnp.float32),   # sum(h - pilot_h)
                pltpu.VMEM((H, 1), jnp.float32),   # sum((h - pilot_h)^2)
                pltpu.VMEM((H, 1), jnp.float32),   # pilot_h
                pltpu.VMEM((S, 1), jnp.float32),   # s0 = rsqrt(var0 + eps)
                pltpu.VMEM((H, 1), jnp.float32),   # folded b1
                pltpu.VMEM((H, 1), jnp.float32),   # c = w3 * rsqrt(var2 + eps)
                pltpu.VMEM((1, 1), jnp.float32),   # d = b3 - sum(mu2 * c)
            ],
        ),
        compiler_params=pltpu.CompilerParams(
            # Both axes must stay sequential: passes 1/2 need completed batch
            # stats, and the running sums live in per-core VMEM scratch.
            # TODO(synk): on v7x, shard the batch-tile axis across the two
            # TensorCores with an explicit cross-core stats combine.
            dimension_semantics=("arbitrary", "arbitrary"),
            vmem_limit_bytes=32 * 1024 * 1024,
        ),
        cost_estimate=pl.CostEstimate(
            flops=flops, transcendentals=B, bytes_accessed=bytes_accessed),
    )(x_t, folded["w1f"], folded["vecs"])

    return out[0, :B][:, None]                    # [B, 1], matching the PyTorch module


def init_raw_params(key, nb_stocks, hidden_size):
    """Deterministic synthetic PyTorch-style parameters for NetworkDOS."""
    S, H = nb_stocks, hidden_size
    k = jax.random.split(key, 8)
    lim1 = 1.0 / jnp.sqrt(S)
    w1 = jax.random.uniform(k[0], (H, S), jnp.float32, -lim1, lim1)
    b1 = jax.random.uniform(k[1], (H,), jnp.float32, -lim1, lim1)
    lim3 = 1.0 / jnp.sqrt(H)
    w3 = jax.random.uniform(k[2], (1, H), jnp.float32, -lim3, lim3)
    b3 = jax.random.uniform(k[3], (1,), jnp.float32, -lim3, lim3)
    bn0_gamma = 1.0 + 0.1 * jax.random.normal(k[4], (S,), jnp.float32)
    bn0_beta = 0.1 * jax.random.normal(k[5], (S,), jnp.float32)
    bn2_gamma = 1.0 + 0.1 * jax.random.normal(k[6], (H,), jnp.float32)
    bn2_beta = 0.1 * jax.random.normal(k[7], (H,), jnp.float32)
    return dict(w1=w1, b1=b1, w3=w3, b3=b3,
                bn0_gamma=bn0_gamma, bn0_beta=bn0_beta,
                bn2_gamma=bn2_gamma, bn2_beta=bn2_beta)


def _reference(x, raw):
    """Pure-JAX reference of the original (unfolded) forward pass."""
    mu0 = jnp.mean(x, axis=0, keepdims=True)
    var0 = jnp.mean((x - mu0) ** 2, axis=0, keepdims=True)
    x0 = (x - mu0) / jnp.sqrt(var0 + EPS) * raw["bn0_gamma"] + raw["bn0_beta"]
    hpre = x0 @ raw["w1"].T + raw["b1"]
    hid = jnp.where(hpre >= 0, hpre, 0.5 * hpre)
    mu2 = jnp.mean(hid, axis=0, keepdims=True)
    var2 = jnp.mean((hid - mu2) ** 2, axis=0, keepdims=True)
    h2 = (hid - mu2) / jnp.sqrt(var2 + EPS) * raw["bn2_gamma"] + raw["bn2_beta"]
    return jax.nn.sigmoid(h2 @ raw["w3"].T + raw["b3"])


if __name__ == "__main__":
    B, NB_STOCKS, HIDDEN = 16, 8, 32
    key = jax.random.PRNGKey(0)
    kx, kp = jax.random.split(key)
    x = jax.random.normal(kx, (B, NB_STOCKS), jnp.float32)

    raw = init_raw_params(kp, NB_STOCKS, HIDDEN)
    folded = fold_params(raw)

    out = network_dos_forward(x, folded)
    out = jax.block_until_ready(out)

    ref = _reference(x, raw)
    assert out.shape == (B, 1)
    assert jnp.allclose(out, ref, atol=5e-5, rtol=5e-5), "mismatch vs reference"
    print("KERNEL_OK")
</pallas_src>

<mosaic_0001>
module attributes {stable_mosaic.version = 11 : i64} {
  func.func @_network_dos_kernel(%arg0: i32, %arg1: i32, %arg2: memref<8x128xf32, #tpu.memory_space<vmem>>, %arg3: memref<32x8xf32, #tpu.memory_space<vmem>>, %arg4: memref<32x4xf32, #tpu.memory_space<vmem>>, %arg5: memref<1x128xf32, #tpu.memory_space<vmem>>, %arg6: memref<8x1xf32, #tpu.memory_space<vmem>>, %arg7: memref<8x1xf32, #tpu.memory_space<vmem>>, %arg8: memref<8x1xf32, #tpu.memory_space<vmem>>, %arg9: memref<32x1xf32, #tpu.memory_space<vmem>>, %arg10: memref<32x1xf32, #tpu.memory_space<vmem>>, %arg11: memref<32x1xf32, #tpu.memory_space<vmem>>, %arg12: memref<8x1xf32, #tpu.memory_space<vmem>>, %arg13: memref<32x1xf32, #tpu.memory_space<vmem>>, %arg14: memref<32x1xf32, #tpu.memory_space<vmem>>, %arg15: memref<1x1xf32, #tpu.memory_space<vmem>>) attributes {dimension_semantics = [#tpu.dimension_semantics<arbitrary>, #tpu.dimension_semantics<arbitrary>], iteration_bounds = array<i64: 3, 1>, scalar_prefetch = 0 : i64, scratch_operands = 10 : i64, tpu.core_type = #tpu.core_type<tc>, window_params = [{transform_indices = @transform_0, window_bounds = array<i64: 8, 128>}, {pipeline_mode = #tpu.pipeline_mode<synchronous>, transform_indices = @transform_1, window_bounds = array<i64: 32, 8>}, {pipeline_mode = #tpu.pipeline_mode<synchronous>, transform_indices = @transform_2, window_bounds = array<i64: 32, 4>}, {pipeline_mode = #tpu.pipeline_mode<synchronous>, transform_indices = @transform_3, window_bounds = array<i64: 1, 128>}]} {
    %c0_i32 = arith.constant 0 : i32
    %0 = arith.cmpi eq, %arg0, %c0_i32 : i32
    %1 = arith.extui %0 : i1 to i32
    %c0_i32_0 = arith.constant 0 : i32
    %2 = arith.cmpi ne, %1, %c0_i32_0 : i32
    scf.if %2 {
      %c0_i32_3 = arith.constant 0 : i32
      %9 = arith.cmpi eq, %arg1, %c0_i32_3 : i32
      %10 = arith.extui %9 : i1 to i32
      %c0_i32_4 = arith.constant 0 : i32
      %11 = arith.cmpi ne, %10, %c0_i32_4 : i32
      scf.if %11 {
        %cst = arith.constant 0.000000e+00 : f32
        %22 = vector.broadcast %cst : f32 to vector<8x1xf32>
        %c0_12 = arith.constant 0 : index
        %c0_13 = arith.constant 0 : index
        %23 = vector.load %arg6[%c0_12, %c0_13] : memref<8x1xf32, #tpu.memory_space<vmem>>, vector<8x1xf32>
        tpu.vector_store %arg6[%c0_12, %c0_13], %22 {strides = array<i32>} : memref<8x1xf32, #tpu.memory_space<vmem>>, vector<8x1xf32>,
        %cst_14 = arith.constant 0.000000e+00 : f32
        %24 = vector.broadcast %cst_14 : f32 to vector<8x1xf32>
        %c0_15 = arith.constant 0 : index
        %c0_16 = arith.constant 0 : index
        %25 = vector.load %arg7[%c0_15, %c0_16] : memref<8x1xf32, #tpu.memory_space<vmem>>, vector<8x1xf32>
        tpu.vector_store %arg7[%c0_15, %c0_16], %24 {strides = array<i32>} : memref<8x1xf32, #tpu.memory_space<vmem>>, vector<8x1xf32>,
        %cst_17 = arith.constant 0.000000e+00 : f32
        %26 = vector.broadcast %cst_17 : f32 to vector<32x1xf32>
        %c0_18 = arith.constant 0 : index
        %c0_19 = arith.constant 0 : index
        %27 = vector.load %arg9[%c0_18, %c0_19] : memref<32x1xf32, #tpu.memory_space<vmem>>, vector<32x1xf32>
        tpu.vector_store %arg9[%c0_18, %c0_19], %26 {strides = array<i32>} : memref<32x1xf32, #tpu.memory_space<vmem>>, vector<32x1xf32>,
        %cst_20 = arith.constant 0.000000e+00 : f32
        %28 = vector.broadcast %cst_20 : f32 to vector<32x1xf32>
        %c0_21 = arith.constant 0 : index
        %c0_22 = arith.constant 0 : index
        %29 = vector.load %arg10[%c0_21, %c0_22] : memref<32x1xf32, #tpu.memory_space<vmem>>, vector<32x1xf32>
        tpu.vector_store %arg10[%c0_21, %c0_22], %28 {strides = array<i32>} : memref<32x1xf32, #tpu.memory_space<vmem>>, vector<32x1xf32>,
        %c0_23 = arith.constant 0 : index
        %c0_24 = arith.constant 0 : index
        %30 = vector.load %arg2[%c0_23, %c0_24] : memref<8x128xf32, #tpu.memory_space<vmem>>, vector<8x1xf32>
        %c0_25 = arith.constant 0 : index
        %c0_26 = arith.constant 0 : index
        %31 = vector.load %arg8[%c0_25, %c0_26] : memref<8x1xf32, #tpu.memory_space<vmem>>, vector<8x1xf32>
        tpu.vector_store %arg8[%c0_25, %c0_26], %30 {strides = array<i32>} : memref<8x1xf32, #tpu.memory_space<vmem>>, vector<8x1xf32>,
      } else {
      }
      %c0 = arith.constant 0 : index
      %c0_5 = arith.constant 0 : index
      %12 = vector.load %arg2[%c0, %c0_5] : memref<8x128xf32, #tpu.memory_space<vmem>>, vector<8x128xf32>
      %c0_6 = arith.constant 0 : index
      %c0_7 = arith.constant 0 : index
      %13 = vector.load %arg8[%c0_6, %c0_7] : memref<8x1xf32, #tpu.memory_space<vmem>>, vector<8x1xf32>
      %14 = vector.broadcast %13 : vector<8x1xf32> to vector<8x128xf32>
      %15 = arith.subf %12, %14 : vector<8x128xf32>
      %c0_i32_8 = arith.constant 0 : i32
      %16 = arith.cmpi ne, %arg1, %c0_i32_8 : i32
      %17 = arith.extui %16 : i1 to i32
      %c0_i32_9 = arith.constant 0 : i32
      %18 = arith.cmpi ne, %17, %c0_i32_9 : i32
      scf.if %18 {
        %c0_12 = arith.constant 0 : index
        %c0_13 = arith.constant 0 : index
        %22 = vector.load %arg6[%c0_12, %c0_13] : memref<8x1xf32, #tpu.memory_space<vmem>>, vector<8x1xf32>
        %cst = arith.constant dense<0.000000e+00> : vector<8xf32>
        %23 = vector.multi_reduction <add>, %15, %cst [1] : vector<8x128xf32> to vector<8xf32>
        %24 = vector.shape_cast %23 : vector<8xf32> to vector<8x1xf32>
        %25 = arith.addf %22, %24 : vector<8x1xf32>
        %c0_14 = arith.constant 0 : index
        %c0_15 = arith.constant 0 : index
        %26 = vector.load %arg6[%c0_14, %c0_15] : memref<8x1xf32, #tpu.memory_space<vmem>>, vector<8x1xf32>
        tpu.vector_store %arg6[%c0_14, %c0_15], %25 {strides = array<i32>} : memref<8x1xf32, #tpu.memory_space<vmem>>, vector<8x1xf32>,
        %c0_16 = arith.constant 0 : index
        %c0_17 = arith.constant 0 : index
        %27 = vector.load %arg7[%c0_16, %c0_17] : memref<8x1xf32, #tpu.memory_space<vmem>>, vector<8x1xf32>
        %28 = arith.mulf %15, %15 : vector<8x128xf32>
        %cst_18 = arith.constant dense<0.000000e+00> : vector<8xf32>
        %29 = vector.multi_reduction <add>, %28, %cst_18 [1] : vector<8x128xf32> to vector<8xf32>
        %30 = vector.shape_cast %29 : vector<8xf32> to vector<8x1xf32>
        %31 = arith.addf %27, %30 : vector<8x1xf32>
        %c0_19 = arith.constant 0 : index
        %c0_20 = arith.constant 0 : index
        %32 = vector.load %arg7[%c0_19, %c0_20] : memref<8x1xf32, #tpu.memory_space<vmem>>, vector<8x1xf32>
        tpu.vector_store %arg7[%c0_19, %c0_20], %31 {strides = array<i32>} : memref<8x1xf32, #tpu.memory_space<vmem>>, vector<8x1xf32>,
      } else {
      }
      %c0_i32_10 = arith.constant 0 : i32
      %19 = arith.cmpi eq, %arg1, %c0_i32_10 : i32
      %20 = arith.extui %19 : i1 to i32
      %c0_i32_11 = arith.constant 0 : i32
      %21 = arith.cmpi ne, %20, %c0_i32_11 : i32
      scf.if %21 {
        %22 = tpu.iota {dimensions = array<i32: 1>} : vector<1x128xi32>
        %c16_i32 = arith.constant 16 : i32
        %23 = vector.broadcast %c16_i32 : i32 to vector<1x128xi32>
        %24 = arith.cmpi slt, %22, %23 : vector<1x128xi32>
        %cst = arith.constant 0.000000e+00 : f32
        %25 = vector.shape_cast %24 : vector<1x128xi1> to vector<1x128xi1>
        %26 = vector.broadcast %25 : vector<1x128xi1> to vector<8x128xi1>
        %27 = vector.broadcast %cst : f32 to vector<8x128xf32>
        %28 = arith.select %26, %15, %27 : vector<8x128xi1>, vector<8x128xf32>
        %c0_12 = arith.constant 0 : index
        %c0_13 = arith.constant 0 : index
        %29 = vector.load %arg6[%c0_12, %c0_13] : memref<8x1xf32, #tpu.memory_space<vmem>>, vector<8x1xf32>
        %cst_14 = arith.constant dense<0.000000e+00> : vector<8xf32>
        %30 = vector.multi_reduction <add>, %28, %cst_14 [1] : vector<8x128xf32> to vector<8xf32>
        %31 = vector.shape_cast %30 : vector<8xf32> to vector<8x1xf32>
        %32 = arith.addf %29, %31 : vector<8x1xf32>
        %c0_15 = arith.constant 0 : index
        %c0_16 = arith.constant 0 : index
        %33 = vector.load %arg6[%c0_15, %c0_16] : memref<8x1xf32, #tpu.memory_space<vmem>>, vector<8x1xf32>
        tpu.vector_store %arg6[%c0_15, %c0_16], %32 {strides = array<i32>} : memref<8x1xf32, #tpu.memory_space<vmem>>, vector<8x1xf32>,
        %c0_17 = arith.constant 0 : index
        %c0_18 = arith.constant 0 : index
        %34 = vector.load %arg7[%c0_17, %c0_18] : memref<8x1xf32, #tpu.memory_space<vmem>>, vector<8x1xf32>
        %35 = arith.mulf %28, %28 : vector<8x128xf32>
        %cst_19 = arith.constant dense<0.000000e+00> : vector<8xf32>
        %36 = vector.multi_reduction <add>, %35, %cst_19 [1] : vector<8x128xf32> to vector<8xf32>
        %37 = vector.shape_cast %36 : vector<8xf32> to vector<8x1xf32>
        %38 = arith.addf %34, %37 : vector<8x1xf32>
        %c0_20 = arith.constant 0 : index
        %c0_21 = arith.constant 0 : index
        %39 = vector.load %arg7[%c0_20, %c0_21] : memref<8x1xf32, #tpu.memory_space<vmem>>, vector<8x1xf32>
        tpu.vector_store %arg7[%c0_20, %c0_21], %38 {strides = array<i32>} : memref<8x1xf32, #tpu.memory_space<vmem>>, vector<8x1xf32>,
      } else {
      }
    } else {
    }
    %c1_i32 = arith.constant 1 : i32
    %3 = arith.cmpi eq, %arg0, %c1_i32 : i32
    %4 = arith.extui %3 : i1 to i32
    %c0_i32_1 = arith.constant 0 : i32
    %5 = arith.cmpi ne, %4, %c0_i32_1 : i32
    scf.if %5 {
      %c0_i32_3 = arith.constant 0 : i32
      %9 = arith.cmpi eq, %arg1, %c0_i32_3 : i32
      %10 = arith.extui %9 : i1 to i32
      %c0_i32_4 = arith.constant 0 : i32
      %11 = arith.cmpi ne, %10, %c0_i32_4 : i32
      scf.if %11 {
        %c0_19 = arith.constant 0 : index
        %c0_20 = arith.constant 0 : index
        %33 = vector.load %arg6[%c0_19, %c0_20] : memref<8x1xf32, #tpu.memory_space<vmem>>, vector<8x1xf32>
        %cst_21 = arith.constant 6.250000e-02 : f32
        %34 = vector.broadcast %cst_21 : f32 to vector<8x1xf32>
        %35 = arith.mulf %33, %34 : vector<8x1xf32>
        %c0_22 = arith.constant 0 : index
        %c0_23 = arith.constant 0 : index
        %36 = vector.load %arg8[%c0_22, %c0_23] : memref<8x1xf32, #tpu.memory_space<vmem>>, vector<8x1xf32>
        %37 = arith.addf %36, %35 : vector<8x1xf32>
        %c0_24 = arith.constant 0 : index
        %c0_25 = arith.constant 0 : index
        %38 = vector.load %arg7[%c0_24, %c0_25] : memref<8x1xf32, #tpu.memory_space<vmem>>, vector<8x1xf32>
        %cst_26 = arith.constant 6.250000e-02 : f32
        %39 = vector.broadcast %cst_26 : f32 to vector<8x1xf32>
        %40 = arith.mulf %38, %39 : vector<8x1xf32>
        %41 = arith.mulf %35, %35 : vector<8x1xf32>
        %42 = arith.subf %40, %41 : vector<8x1xf32>
        %cst_27 = arith.constant 0.000000e+00 : f32
        %43 = vector.broadcast %cst_27 : f32 to vector<8x1xf32>
        %44 = arith.maximumf %42, %43 : vector<8x1xf32>
        %cst_28 = arith.constant 9.99999974E-6 : f32
        %45 = vector.broadcast %cst_28 : f32 to vector<8x1xf32>
        %46 = arith.addf %44, %45 : vector<8x1xf32>
        %47 = math.rsqrt %46 : vector<8x1xf32>
        %c0_29 = arith.constant 0 : index
        %c0_30 = arith.constant 0 : index
        %48 = vector.load %arg12[%c0_29, %c0_30] : memref<8x1xf32, #tpu.memory_space<vmem>>, vector<8x1xf32>
        tpu.vector_store %arg12[%c0_29, %c0_30], %47 {strides = array<i32>} : memref<8x1xf32, #tpu.memory_space<vmem>>, vector<8x1xf32>,
        %c0_31 = arith.constant 0 : index
        %c0_32 = arith.constant 0 : index
        %49 = vector.load %arg4[%c0_31, %c0_32] : memref<32x4xf32, #tpu.memory_space<vmem>>, vector<32x1xf32>
        %c0_33 = arith.constant 0 : index
        %c0_34 = arith.constant 0 : index
        %50 = vector.load %arg3[%c0_33, %c0_34] : memref<32x8xf32, #tpu.memory_space<vmem>>, vector<32x8xf32>
        %51 = arith.mulf %37, %47 : vector<8x1xf32>
        %cst_35 = arith.constant dense<0.000000e+00> : vector<32x1xf32>
        %52 = tpu.matmul %50, %51, %cst_35 {dimension_numbers = #tpu.dot_dimension_numbers<[1], [0], [0], [1], [0, 0, 1, 1], [], []>} : vector<32x8xf32>, vector<8x1xf32>, vector<32x1xf32> -> vector<32x1xf32>
        %53 = arith.subf %49, %52 : vector<32x1xf32>
        %c0_36 = arith.constant 0 : index
        %c0_37 = arith.constant 0 : index
        %54 = vector.load %arg13[%c0_36, %c0_37] : memref<32x1xf32, #tpu.memory_space<vmem>>, vector<32x1xf32>
        tpu.vector_store %arg13[%c0_36, %c0_37], %53 {strides = array<i32>} : memref<32x1xf32, #tpu.memory_space<vmem>>, vector<32x1xf32>,
        %c0_38 = arith.constant 0 : index
        %c0_39 = arith.constant 0 : index
        %55 = vector.load %arg3[%c0_38, %c0_39] : memref<32x8xf32, #tpu.memory_space<vmem>>, vector<32x8xf32>
        %c0_40 = arith.constant 0 : index
        %c0_41 = arith.constant 0 : index
        %56 = vector.load %arg8[%c0_40, %c0_41] : memref<8x1xf32, #tpu.memory_space<vmem>>, vector<8x1xf32>
        %57 = arith.mulf %56, %47 : vector<8x1xf32>
        %cst_42 = arith.constant dense<0.000000e+00> : vector<32x1xf32>
        %58 = tpu.matmul %55, %57, %cst_42 {dimension_numbers = #tpu.dot_dimension_numbers<[1], [0], [0], [1], [0, 0, 1, 1], [], []>} : vector<32x8xf32>, vector<8x1xf32>, vector<32x1xf32> -> vector<32x1xf32>
        %c0_43 = arith.constant 0 : index
        %c0_44 = arith.constant 0 : index
        %59 = vector.load %arg13[%c0_43, %c0_44] : memref<32x1xf32, #tpu.memory_space<vmem>>, vector<32x1xf32>
        %60 = arith.addf %58, %59 : vector<32x1xf32>
        %cst_45 = arith.constant 5.000000e-01 : f32
        %61 = vector.broadcast %cst_45 : f32 to vector<32x1xf32>
        %62 = arith.mulf %61, %60 : vector<32x1xf32>
        %63 = arith.maximumf %60, %62 : vector<32x1xf32>
        %c0_46 = arith.constant 0 : index
        %c0_47 = arith.constant 0 : index
        %64 = vector.load %arg11[%c0_46, %c0_47] : memref<32x1xf32, #tpu.memory_space<vmem>>, vector<32x1xf32>
        tpu.vector_store %arg11[%c0_46, %c0_47], %63 {strides = array<i32>} : memref<32x1xf32, #tpu.memory_space<vmem>>, vector<32x1xf32>,
      } else {
      }
      %c0 = arith.constant 0 : index
      %c0_5 = arith.constant 0 : index
      %12 = vector.load %arg2[%c0, %c0_5] : memref<8x128xf32, #tpu.memory_space<vmem>>, vector<8x128xf32>
      %c0_6 = arith.constant 0 : index
      %c0_7 = arith.constant 0 : index
      %13 = vector.load %arg12[%c0_6, %c0_7] : memref<8x1xf32, #tpu.memory_space<vmem>>, vector<8x1xf32>
      %14 = vector.broadcast %13 : vector<8x1xf32> to vector<8x128xf32>
      %15 = arith.mulf %12, %14 : vector<8x128xf32>
      %c0_8 = arith.constant 0 : index
      %c0_9 = arith.constant 0 : index
      %16 = vector.load %arg3[%c0_8, %c0_9] : memref<32x8xf32, #tpu.memory_space<vmem>>, vector<32x8xf32>
      %cst = arith.constant dense<0.000000e+00> : vector<32x128xf32>
      %17 = tpu.matmul %16, %15, %cst {dimension_numbers = #tpu.dot_dimension_numbers<[1], [0], [0], [1], [0, 0, 1, 1], [], []>} : vector<32x8xf32>, vector<8x128xf32>, vector<32x128xf32> -> vector<32x128xf32>
      %c0_10 = arith.constant 0 : index
      %c0_11 = arith.constant 0 : index
      %18 = vector.load %arg13[%c0_10, %c0_11] : memref<32x1xf32, #tpu.memory_space<vmem>>, vector<32x1xf32>
      %19 = vector.broadcast %18 : vector<32x1xf32> to vector<32x128xf32>
      %20 = arith.addf %17, %19 : vector<32x128xf32>
      %cst_12 = arith.constant 5.000000e-01 : f32
      %21 = vector.broadcast %cst_12 : f32 to vector<32x128xf32>
      %22 = arith.mulf %21, %20 : vector<32x128xf32>
      %23 = arith.maximumf %20, %22 : vector<32x128xf32>
      %c0_13 = arith.constant 0 : index
      %c0_14 = arith.constant 0 : index
      %24 = vector.load %arg11[%c0_13, %c0_14] : memref<32x1xf32, #tpu.memory_space<vmem>>, vector<32x1xf32>
      %25 = vector.broadcast %24 : vector<32x1xf32> to vector<32x128xf32>
      %26 = arith.subf %23, %25 : vector<32x128xf32>
      %c0_i32_15 = arith.constant 0 : i32
      %27 = arith.cmpi ne, %arg1, %c0_i32_15 : i32
      %28 = arith.extui %27 : i1 to i32
      %c0_i32_16 = arith.constant 0 : i32
      %29 = arith.cmpi ne, %28, %c0_i32_16 : i32
      scf.if %29 {
        %c0_19 = arith.constant 0 : index
        %c0_20 = arith.constant 0 : index
        %33 = vector.load %arg9[%c0_19, %c0_20] : memref<32x1xf32, #tpu.memory_space<vmem>>, vector<32x1xf32>
        %cst_21 = arith.constant dense<0.000000e+00> : vector<32xf32>
        %34 = vector.multi_reduction <add>, %26, %cst_21 [1] : vector<32x128xf32> to vector<32xf32>
        %35 = vector.shape_cast %34 : vector<32xf32> to vector<32x1xf32>
        %36 = arith.addf %33, %35 : vector<32x1xf32>
        %c0_22 = arith.constant 0 : index
        %c0_23 = arith.constant 0 : index
        %37 = vector.load %arg9[%c0_22, %c0_23] : memref<32x1xf32, #tpu.memory_space<vmem>>, vector<32x1xf32>
        tpu.vector_store %arg9[%c0_22, %c0_23], %36 {strides = array<i32>} : memref<32x1xf32, #tpu.memory_space<vmem>>, vector<32x1xf32>,
        %c0_24 = arith.constant 0 : index
        %c0_25 = arith.constant 0 : index
        %38 = vector.load %arg10[%c0_24, %c0_25] : memref<32x1xf32, #tpu.memory_space<vmem>>, vector<32x1xf32>
        %39 = arith.mulf %26, %26 : vector<32x128xf32>
        %cst_26 = arith.constant dense<0.000000e+00> : vector<32xf32>
        %40 = vector.multi_reduction <add>, %39, %cst_26 [1] : vector<32x128xf32> to vector<32xf32>
        %41 = vector.shape_cast %40 : vector<32xf32> to vector<32x1xf32>
        %42 = arith.addf %38, %41 : vector<32x1xf32>
        %c0_27 = arith.constant 0 : index
        %c0_28 = arith.constant 0 : index
        %43 = vector.load %arg10[%c0_27, %c0_28] : memref<32x1xf32, #tpu.memory_space<vmem>>, vector<32x1xf32>
        tpu.vector_store %arg10[%c0_27, %c0_28], %42 {strides = array<i32>} : memref<32x1xf32, #tpu.memory_space<vmem>>, vector<32x1xf32>,
      } else {
      }
      %c0_i32_17 = arith.constant 0 : i32
      %30 = arith.cmpi eq, %arg1, %c0_i32_17 : i32
      %31 = arith.extui %30 : i1 to i32
      %c0_i32_18 = arith.constant 0 : i32
      %32 = arith.cmpi ne, %31, %c0_i32_18 : i32
      scf.if %32 {
        %33 = tpu.iota {dimensions = array<i32: 1>} : vector<1x128xi32>
        %c16_i32 = arith.constant 16 : i32
        %34 = vector.broadcast %c16_i32 : i32 to vector<1x128xi32>
        %35 = arith.cmpi slt, %33, %34 : vector<1x128xi32>
        %cst_19 = arith.constant 0.000000e+00 : f32
        %36 = vector.shape_cast %35 : vector<1x128xi1> to vector<1x128xi1>
        %37 = vector.broadcast %36 : vector<1x128xi1> to vector<32x128xi1>
        %38 = vector.broadcast %cst_19 : f32 to vector<32x128xf32>
        %39 = arith.select %37, %26, %38 : vector<32x128xi1>, vector<32x128xf32>
        %c0_20 = arith.constant 0 : index
        %c0_21 = arith.constant 0 : index
        %40 = vector.load %arg9[%c0_20, %c0_21] : memref<32x1xf32, #tpu.memory_space<vmem>>, vector<32x1xf32>
        %cst_22 = arith.constant dense<0.000000e+00> : vector<32xf32>
        %41 = vector.multi_reduction <add>, %39, %cst_22 [1] : vector<32x128xf32> to vector<32xf32>
        %42 = vector.shape_cast %41 : vector<32xf32> to vector<32x1xf32>
        %43 = arith.addf %40, %42 : vector<32x1xf32>
        %c0_23 = arith.constant 0 : index
        %c0_24 = arith.constant 0 : index
        %44 = vector.load %arg9[%c0_23, %c0_24] : memref<32x1xf32, #tpu.memory_space<vmem>>, vector<32x1xf32>
        tpu.vector_store %arg9[%c0_23, %c0_24], %43 {strides = array<i32>} : memref<32x1xf32, #tpu.memory_space<vmem>>, vector<32x1xf32>,
        %c0_25 = arith.constant 0 : index
        %c0_26 = arith.constant 0 : index
        %45 = vector.load %arg10[%c0_25, %c0_26] : memref<32x1xf32, #tpu.memory_space<vmem>>, vector<32x1xf32>
        %46 = arith.mulf %39, %39 : vector<32x128xf32>
        %cst_27 = arith.constant dense<0.000000e+00> : vector<32xf32>
        %47 = vector.multi_reduction <add>, %46, %cst_27 [1] : vector<32x128xf32> to vector<32xf32>
        %48 = vector.shape_cast %47 : vector<32xf32> to vector<32x1xf32>
        %49 = arith.addf %45, %48 : vector<32x1xf32>
        %c0_28 = arith.constant 0 : index
        %c0_29 = arith.constant 0 : index
        %50 = vector.load %arg10[%c0_28, %c0_29] : memref<32x1xf32, #tpu.memory_space<vmem>>, vector<32x1xf32>
        tpu.vector_store %arg10[%c0_28, %c0_29], %49 {strides = array<i32>} : memref<32x1xf32, #tpu.memory_space<vmem>>, vector<32x1xf32>,
      } else {
      }
    } else {
    }
    %c2_i32 = arith.constant 2 : i32
    %6 = arith.cmpi eq, %arg0, %c2_i32 : i32
    %7 = arith.extui %6 : i1 to i32
    %c0_i32_2 = arith.constant 0 : i32
    %8 = arith.cmpi ne, %7, %c0_i32_2 : i32
    scf.if %8 {
      %c0_i32_3 = arith.constant 0 : i32
      %9 = arith.cmpi eq, %arg1, %c0_i32_3 : i32
      %10 = arith.extui %9 : i1 to i32
      %c0_i32_4 = arith.constant 0 : i32
      %11 = arith.cmpi ne, %10, %c0_i32_4 : i32
      scf.if %11 {
        %c0_22 = arith.constant 0 : index
        %c0_23 = arith.constant 0 : index
        %49 = vector.load %arg9[%c0_22, %c0_23] : memref<32x1xf32, #tpu.memory_space<vmem>>, vector<32x1xf32>
        %cst_24 = arith.constant 6.250000e-02 : f32
        %50 = vector.broadcast %cst_24 : f32 to vector<32x1xf32>
        %51 = arith.mulf %49, %50 : vector<32x1xf32>
        %c0_25 = arith.constant 0 : index
        %c0_26 = arith.constant 0 : index
        %52 = vector.load %arg11[%c0_25, %c0_26] : memref<32x1xf32, #tpu.memory_space<vmem>>, vector<32x1xf32>
        %53 = arith.addf %52, %51 : vector<32x1xf32>
        %c0_27 = arith.constant 0 : index
        %c0_28 = arith.constant 0 : index
        %54 = vector.load %arg10[%c0_27, %c0_28] : memref<32x1xf32, #tpu.memory_space<vmem>>, vector<32x1xf32>
        %cst_29 = arith.constant 6.250000e-02 : f32
        %55 = vector.broadcast %cst_29 : f32 to vector<32x1xf32>
        %56 = arith.mulf %54, %55 : vector<32x1xf32>
        %57 = arith.mulf %51, %51 : vector<32x1xf32>
        %58 = arith.subf %56, %57 : vector<32x1xf32>
        %cst_30 = arith.constant 0.000000e+00 : f32
        %59 = vector.broadcast %cst_30 : f32 to vector<32x1xf32>
        %60 = arith.maximumf %58, %59 : vector<32x1xf32>
        %c0_31 = arith.constant 0 : index
        %c1 = arith.constant 1 : index
        %61 = vector.load %arg4[%c0_31, %c1] : memref<32x4xf32, #tpu.memory_space<vmem>>, vector<32x1xf32>
        %cst_32 = arith.constant 9.99999974E-6 : f32
        %62 = vector.broadcast %cst_32 : f32 to vector<32x1xf32>
        %63 = arith.addf %60, %62 : vector<32x1xf32>
        %64 = math.rsqrt %63 : vector<32x1xf32>
        %65 = arith.mulf %61, %64 : vector<32x1xf32>
        %c0_33 = arith.constant 0 : index
        %c0_34 = arith.constant 0 : index
        %66 = vector.load %arg14[%c0_33, %c0_34] : memref<32x1xf32, #tpu.memory_space<vmem>>, vector<32x1xf32>
        tpu.vector_store %arg14[%c0_33, %c0_34], %65 {strides = array<i32>} : memref<32x1xf32, #tpu.memory_space<vmem>>, vector<32x1xf32>,
        %c0_35 = arith.constant 0 : index
        %c2 = arith.constant 2 : index
        %67 = vector.load %arg4[%c0_35, %c2] : memref<32x4xf32, #tpu.memory_space<vmem>>, vector<1x1xf32>
        %68 = arith.mulf %53, %65 : vector<32x1xf32>
        %cst_36 = arith.constant dense<0.000000e+00> : vector<1xf32>
        %69 = vector.multi_reduction <add>, %68, %cst_36 [0] : vector<32x1xf32> to vector<1xf32>
        %70 = vector.shape_cast %69 : vector<1xf32> to vector<1x1xf32>
        %71 = arith.subf %67, %70 : vector<1x1xf32>
        %c0_37 = arith.constant 0 : index
        %c0_38 = arith.constant 0 : index
        %72 = vector.load %arg15[%c0_37, %c0_38] : memref<1x1xf32, #tpu.memory_space<vmem>>, vector<1x1xf32>
        tpu.vector_store %arg15[%c0_37, %c0_38], %71 {strides = array<i32>} : memref<1x1xf32, #tpu.memory_space<vmem>>, vector<1x1xf32>,
      } else {
      }
      %c0 = arith.constant 0 : index
      %c0_5 = arith.constant 0 : index
      %12 = vector.load %arg2[%c0, %c0_5] : memref<8x128xf32, #tpu.memory_space<vmem>>, vector<8x128xf32>
      %c0_6 = arith.constant 0 : index
      %c0_7 = arith.constant 0 : index
      %13 = vector.load %arg12[%c0_6, %c0_7] : memref<8x1xf32, #tpu.memory_space<vmem>>, vector<8x1xf32>
      %14 = vector.broadcast %13 : vector<8x1xf32> to vector<8x128xf32>
      %15 = arith.mulf %12, %14 : vector<8x128xf32>
      %c0_8 = arith.constant 0 : index
      %c0_9 = arith.constant 0 : index
      %16 = vector.load %arg3[%c0_8, %c0_9] : memref<32x8xf32, #tpu.memory_space<vmem>>, vector<32x8xf32>
      %cst = arith.constant dense<0.000000e+00> : vector<32x128xf32>
      %17 = tpu.matmul %16, %15, %cst {dimension_numbers = #tpu.dot_dimension_numbers<[1], [0], [0], [1], [0, 0, 1, 1], [], []>} : vector<32x8xf32>, vector<8x128xf32>, vector<32x128xf32> -> vector<32x128xf32>
      %c0_10 = arith.constant 0 : index
      %c0_11 = arith.constant 0 : index
      %18 = vector.load %arg13[%c0_10, %c0_11] : memref<32x1xf32, #tpu.memory_space<vmem>>, vector<32x1xf32>
      %19 = vector.broadcast %18 : vector<32x1xf32> to vector<32x128xf32>
      %20 = arith.addf %17, %19 : vector<32x128xf32>
      %cst_12 = arith.constant 5.000000e-01 : f32
      %21 = vector.broadcast %cst_12 : f32 to vector<32x128xf32>
      %22 = arith.mulf %21, %20 : vector<32x128xf32>
      %23 = arith.maximumf %20, %22 : vector<32x128xf32>
      %c0_13 = arith.constant 0 : index
      %c0_14 = arith.constant 0 : index
      %24 = vector.load %arg14[%c0_13, %c0_14] : memref<32x1xf32, #tpu.memory_space<vmem>>, vector<32x1xf32>
      %25 = vector.broadcast %24 : vector<32x1xf32> to vector<32x128xf32>
      %26 = arith.mulf %23, %25 : vector<32x128xf32>
      %cst_15 = arith.constant dense<0.000000e+00> : vector<128xf32>
      %27 = vector.multi_reduction <add>, %26, %cst_15 [0] : vector<32x128xf32> to vector<128xf32>
      %28 = vector.shape_cast %27 : vector<128xf32> to vector<1x128xf32>
      %c0_16 = arith.constant 0 : index
      %c0_17 = arith.constant 0 : index
      %29 = vector.load %arg15[%c0_16, %c0_17] : memref<1x1xf32, #tpu.memory_space<vmem>>, vector<1x1xf32>
      %30 = vector.broadcast %29 : vector<1x1xf32> to vector<1x128xf32>
      %31 = arith.addf %28, %30 : vector<1x128xf32>
      %32 = arith.negf %31 : vector<1x128xf32>
      %33 = math.exp %32 : vector<1x128xf32>
      %cst_18 = arith.constant 1.000000e+00 : f32
      %34 = vector.broadcast %cst_18 : f32 to vector<1x128xf32>
      %35 = arith.addf %34, %33 : vector<1x128xf32>
      %36 = arith.divf %34, %35 : vector<1x128xf32>
      %37 = tpu.iota {dimensions = array<i32: 1>} : vector<1x128xi32>
      %c128_i32 = arith.constant 128 : i32
      %38 = arith.muli %arg1, %c128_i32 : i32
      %39 = vector.broadcast %38 : i32 to vector<1x128xi32>
      %40 = arith.addi %37, %39 : vector<1x128xi32>
      %c16_i32 = arith.constant 16 : i32
      %41 = vector.broadcast %c16_i32 : i32 to vector<1x128xi32>
      %42 = arith.cmpi slt, %40, %41 : vector<1x128xi32>
      %cst_19 = arith.constant 0.000000e+00 : f32
      %43 = vector.broadcast %cst_19 : f32 to vector<1x128xf32>
      %44 = arith.select %42, %36, %43 : vector<1x128xi1>, vector<1x128xf32>
      %c128_i32_20 = arith.constant 128 : i32
      %45 = arith.muli %arg1, %c128_i32_20 : i32
      %46 = tpu.assume_multiple %45, 128 : i32
      %c0_21 = arith.constant 0 : index
      %47 = arith.index_cast %46 : i32 to index
      %48 = vector.load %arg5[%c0_21, %47] : memref<1x128xf32, #tpu.memory_space<vmem>>, vector<1x128xf32>
      tpu.vector_store %arg5[%c0_21, %47], %44 {strides = array<i32>} : memref<1x128xf32, #tpu.memory_space<vmem>>, vector<1x128xf32>,
    } else {
    }
    return
  }
  func.func @transform_0(%arg0: i32, %arg1: i32) -> (i32, i32) {
    %c0_i32 = arith.constant 0 : i32
    %c0_i32_0 = arith.constant 0 : i32
    return %c0_i32, %arg1 : i32, i32
  }
  func.func @transform_1(%arg0: i32, %arg1: i32) -> (i32, i32) {
    %c0_i32 = arith.constant 0 : i32
    %c0_i32_0 = arith.constant 0 : i32
    %c0_i32_1 = arith.constant 0 : i32
    return %c0_i32, %c0_i32_0 : i32, i32
  }
  func.func @transform_2(%arg0: i32, %arg1: i32) -> (i32, i32) {
    %c0_i32 = arith.constant 0 : i32
    %c0_i32_0 = arith.constant 0 : i32
    %c0_i32_1 = arith.constant 0 : i32
    return %c0_i32, %c0_i32_0 : i32, i32
  }
  func.func @transform_3(%arg0: i32, %arg1: i32) -> (i32, i32) {
    %c0_i32 = arith.constant 0 : i32
    %c0_i32_0 = arith.constant 0 : i32
    %c0_i32_1 = arith.constant 0 : i32
    return %c0_i32, %c0_i32_0 : i32, i32
  }
}

</mosaic_0001>

<bundles_post_ra>
// kernel: tpu_custom_call.1
= control target key start
LH: loop header
LB: loop body
LE: loop exit
PB: predicated region body
PF: predicated region fallthrough
CT: control target
= control target key end

     0   :  { %8 = vsyncpa [#allocation13], 0  ;;  %s1380_s12 = smov 0   ;;  %s1382_s13 = smov 0   ;;  %s1579_s0 = inlined_call_operand.vmem [shape: f32[8,128], index: 0, kind: input, shape index: {}]   ;;  %s1580_s1 = inlined_call_operand.vmem [shape: f32[32,8], index: 1, kind: input, shape index: {}]   ;;  %s1581_s2 = inlined_call_operand.vmem [shape: f32[32,4], index: 2, kind: input, shape index: {}]   ;;  %s1582_s3 = inlined_call_operand.hbm [shape: f32[1,128], index: 3, kind: output, shape index: {}]  }
   0x1   :  { %s1384_s14 = smov 0  }
   0x2 LB: > { %s1155_s15 = sadd.s32 4294967295, %s1349_s14   ;;  %s26_s16 = sadd.s32 1, %s1345_s13  ;;  %s1349_s14 = sphi %s1384_s14, %s14_s14   ;;  %s1345_s13 = sphi %s1382_s13, %s1585_s13   ;;  %s1341_s12 = sphi %s1380_s12, %s1584_s12  }
   0x3   : > { %p28_p0 = scmp.ge.s32.totalorder %s26_s16, 3  ;;  %p1158_p1 = scmp.ge.s32.totalorder %s1349_s14, 1 }
   0x4   : > { %p144_p2 = scmp.lt.s32.totalorder %s1349_s14, 4 }
   0x5   : > { %s1587_s16 = smov (%p28_p0, %s26_s16), 0 }
   0x6   : > { %p145_p3 = pnand %p1158_p1, %p144_p2 }
   0x7   : > { %p1159_p4 = scmp.ne.s32.totalorder (!%p145_p3), %s1341_s12, 0 }
   0x8   : > { %148 = sbr.rel (%p145_p3) target bundleno = 1565 (0x61d), region = 32 }
   0xf   : > { %169 = sbr.rel (%p1159_p4) target bundleno = 302 (0x12e), region = 36  ;;  %vm174_vm0 = vcmask (!%p1159_p4), 7168   ;;  %v185_v0 = vld [vmem:[%s1579_s0] sm:$0xff] (!%p1159_p4)  ;;  %v1351_v1 = vmov (!%p1159_p4), 0   ;;  %v1352_v3 = vmov (!%p1159_p4), 0.0   ;;  %v214_v4 = vlaneseq (!%p1159_p4) }
  0x10   : > { %1278 = vset.pattern.permute.xlu0 (!%p1159_p4), %v1351_v1  ;;  %186 = vst.msk [vmem:[#allocation4] sm:$0xff] (!%p1159_p4), %vm174_vm0, %v185_v0  ;;  %175 = vst.msk [vmem:[#allocation2] sm:$0xff] (!%p1159_p4), %vm174_vm0, %v1352_v3 }
  0x11   : > { %177 = vst.msk [vmem:[#allocation5] sm:$0xff] (!%p1159_p4), %vm174_vm0, %v1352_v3  ;;  %178 = vst.msk [vmem:[#allocation5 + $0x8] sm:$0xff] (!%p1159_p4), %vm174_vm0, %v1352_v3  ;;  %v215_v5 = vand.u32 (!%p1159_p4), 127, %v214_v4 }
  0x12   : > { %179 = vst.msk [vmem:[#allocation5 + $0x10] sm:$0xff] (!%p1159_p4), %vm174_vm0, %v1352_v3  ;;  %180 = vst.msk [vmem:[#allocation5 + $0x18] sm:$0xff] (!%p1159_p4), %vm174_vm0, %v1352_v3 }
  0x13   : > { %181 = vst.msk [vmem:[#allocation6] sm:$0xff] (!%p1159_p4), %vm174_vm0, %v1352_v3  ;;  %182 = vst.msk [vmem:[#allocation6 + $0x8] sm:$0xff] (!%p1159_p4), %vm174_vm0, %v1352_v3  ;;  %vm216_vm1 = vcmp.lt.s32.totalorder (!%p1159_p4), %v215_v5, 16 }
  0x14   : > { %183 = vst.msk [vmem:[#allocation6 + $0x10] sm:$0xff] (!%p1159_p4), %vm174_vm0, %v1352_v3  ;;  %184 = vst.msk [vmem:[#allocation6 + $0x18] sm:$0xff] (!%p1159_p4), %vm174_vm0, %v1352_v3 }
  0x15   : > { %176 = vst.msk [vmem:[#allocation3] sm:$0xff] (!%p1159_p4), %vm174_vm0, %v1352_v3 }
  0x17   : > { %v188_v2 = vld [vmem:[#allocation4] sm:$0xff]  ;;  %v220_v10 = vld [vmem:[#allocation2] sm:$0xff] }
  0x18   : > { %191 = vperm.xlu0 %1278, %v188_v2  }
  0x1c   : > { %v226_v12 = vld [vmem:[#allocation3] sm:$0xff] }
  0x97   : > { %v192_v6 = vpop.permute.xlu0 %191 }
  0x98   : > { %v194_v7 = vsub.f32 %v185_v0, %v192_v6 }
  0x9a   : > { %v219_v8 = vsel %vm216_vm1, %v194_v7, 0.0 }
  0x9b   : > { %221 = vadd.xlane.f32.xlu0 %v219_v8  ;;  %v227_v9 = vmul.f32 %v219_v8, %v219_v8 }
  0x9d   : > { %228 = vadd.xlane.f32.xlu1 %v227_v9 }
 0x128   : > { %v222_v11 = vpop.xlane.xlu0 %221 }
 0x129   : > { %v223_v13 = vadd.f32 %v222_v11, %v220_v10 }
 0x12a   : > { %v229_v14 = vpop.xlane.xlu1 %228 }
 0x12b   : > { %225 = vst.msk [vmem:[#allocation2] sm:$0xff] %vm174_vm0, %v223_v13  ;;  %v230_v15 = vadd.f32 %v229_v14, %v226_v12 }
 0x12d   : > { %231 = vst.msk [vmem:[#allocation3] sm:$0xff] %vm174_vm0, %v230_v15 }
 0x12e PF: > { %p1160_p5 = scmp.ne.s32.totalorder %s1341_s12, 1 }
 0x12f   : > { %vm262_vm2 = vcmask (!%p1160_p5), 64512   ;;  %v257_v20 = vld [vmem:[%s1580_s1] sm:$0xff] (!%p1160_p5)  ;;  %v259_v21 = vld [vmem:[%s1580_s1 + $0x10] sm:$0xff] (!%p1160_p5)  ;;  %v1353_v22 = vmov (!%p1160_p5), 0   ;;  %vm251_vm3 = vcmask (!%p1160_p5), 7168   ;;  %v258_v31 = vld [vmem:[%s1580_s1 + $0x8] sm:$0xff] (!%p1160_p5) }
 0x130   : > { %235 = sbr.rel (%p1160_p5) target bundleno = 860 (0x35c), region = 52  ;;  %1279 = vset.pattern.permute.xlu0 (!%p1160_p5), %v1353_v22  ;;  %1280 = vset.pattern.permute.xlu1 (!%p1160_p5), %v1353_v22  ;;  %v242_v27 = vld [vmem:[#allocation4] sm:$0xff] (!%p1160_p5)  ;;  %v260_v32 = vld [vmem:[%s1580_s1 + $0x18] sm:$0xff] (!%p1160_p5)  ;;  %v487_v35 = vld [vmem:[%s1579_s0] sm:$0xff] (!%p1160_p5) }
 0x131   : > { %1205 = vmatprep.mubr.msk.f32.mxu0 (!%p1160_p5), %vm262_vm2, %v257_v20  ;;  %1208 = vmatprep.mubr.msk.f32.mxu1 (!%p1160_p5), %vm262_vm2, %v259_v21  ;;  %v254_v38 = vld [vmem:[%s1581_s2 + $0x8] sm:$0xff] (!%p1160_p5)  ;;  %v256_v39 = vld [vmem:[%s1581_s2 + $0x18] sm:$0xff] (!%p1160_p5)  ;;  %v253_v40 = vld [vmem:[%s1581_s2] sm:$0xff] (!%p1160_p5) }
 0x132   : > { %v240_v16 = vld [vmem:[#allocation2] sm:$0xff] (!%p1160_p5)  ;;  %v255_v41 = vld [vmem:[%s1581_s2 + $0x10] sm:$0xff] (!%p1160_p5) }
 0x133   : > { %v241_v18 = vmul.f32 (!%p1160_p5), 0.0625, %v240_v16 }
 0x134   : > { %v244_v17 = vld [vmem:[#allocation3] sm:$0xff] (!%p1160_p5) }
 0x135   : > { %v245_v19 = vmul.f32 (!%p1160_p5), 0.0625, %v244_v17  ;;  %v246_v23 = vmul.f32 (!%p1160_p5), %v241_v18, %v241_v18  ;;  %v243_v28 = vadd.f32 (!%p1160_p5), %v242_v27, %v241_v18  ;;  %v709_v18 = vlaneseq (!%p1160_p5) }
 0x137   : > { %v247_v24 = vsub.f32 %v245_v19, %v246_v23 }
 0x139   : > { %v248_v25 = vmax.f32 %v247_v24, 0.0  ;;  %v710_v24 = vand.u32 127, %v709_v18 }
 0x13b   : > { %v249_v26 = vadd.f32 1e-05, %v248_v25  ;;  %vm711_vm4 = vcmp.lt.s32.totalorder %v710_v24, 16 }
 0x13d   : > { %1281 = vrsqrt.f32 %v249_v26 }
 0x147   : > { %v1282_v29 = vpop.eup %1281 }
 0x148   : > { %v261_v30 = vmul.f32 %v1282_v29, %v243_v28  ;;  %252 = vst.msk [vmem:[#allocation8] sm:$0xff] %vm251_vm3, %v1282_v29  ;;  %v373_v33 = vmul.f32 %v1282_v29, %v242_v27 }
 0x14a   : > { %1203 = vmatprep.subr.mxu0 %v261_v30  ;;  %1235 = vmatprep.subr.mxu1 %v261_v30 }
 0x14b   : > { %1204 = vmatpush3.msra.mxu0 %v261_v30  ;;  %1236 = vmatpush3.msra.mxu1 %v261_v30 }
 0x14c   : > { %1206 = vmatmul.mubr.msk.f32.vlgmr.msra.gmra.mrb[0].mxu0 %vm262_vm2, %v258_v31  ;;  %1209 = vmatmul.mubr.msk.f32.vlgmr.msra.gmra.mrb[0].mxu1 %vm262_vm2, %v260_v32 }
 0x14d   : > { %1211 = vmatprep.subr.mxu1 %v373_v33  ;;  %1213 = vmatprep.mubr.msk.f32.mxu1 %vm262_vm2, %v257_v20 }
 0x14e   : > { %1212 = vmatpush3.msra.mxu1 %v373_v33  ;;  %1221 = vmatprep.mubr.msk.f32.mxu0 %vm262_vm2, %v257_v20 }
 0x14f   : > { %v488_v34 = vld [vmem:[#allocation8] sm:$0xff] }
 0x150   : > { %491 = vperm.xlu0 %1279, %v488_v34   ;;  %1214 = vmatmul.mubr.msk.f32.vlgmr.msra.gmra.mrb[2].mxu1 %vm262_vm2, %v258_v31 }
 0x151   : > { %1216 = vmatprep.mubr.msk.f32.mxu1 %vm262_vm2, %v259_v21 }
 0x154   : > { %1217 = vmatmul.mubr.msk.f32.gmra.mrb[4].mxu1 %vm262_vm2, %v260_v32 }
 0x1cf   : > { %v492_v36 = vpop.permute.xlu0 %491 }
 0x1d0   : > { %v494_v37 = vmul.f32 %v492_v36, %v487_v35 }
 0x1d2   : > { %1219 = vmatprep.subr.mxu0 %v494_v37 }
 0x1d3   : > { %1220 = vmatpush3.msra.mxu0 %v494_v37 }
 0x1d4   : > { %1222 = vmatmul.mubr.msk.f32.vlgmr.msra.gmra.mrb[2].mxu0 %vm262_vm2, %v258_v31 }
 0x1d5   : > { %1224 = vmatprep.mubr.msk.f32.mxu0 %vm262_vm2, %v259_v21 }
 0x1d8   : > { %1225 = vmatmul.mubr.msk.f32.gmra.mrb[4].mxu0 %vm262_vm2, %v260_v32 }
 0x21f   : > { %v1207_v42 = vpop.f32.mrb[0].mxu0  ;;  %v1210_v43 = vpop.f32.mrb[0].mxu1 }
 0x220   : > { %v361_v44 = vsub.f32 %v254_v38, %v1207_v42  ;;  %v363_v45 = vsub.f32 %v256_v39, %v1210_v43  ;;  %v341_v46 = vpop.f32.mrb[1].mxu0  ;;  %v351_v47 = vpop.f32.mrb[1].mxu1 }
 0x221   : > { %v360_v48 = vsub.f32 %v253_v40, %v341_v46  ;;  %v362_v49 = vsub.f32 %v255_v41, %v351_v47 }
 0x222   : > { %365 = vst.msk [vmem:[#allocation9 + $0x8] sm:$0xff] %vm251_vm3, %v361_v44  ;;  %367 = vst.msk [vmem:[#allocation9 + $0x18] sm:$0xff] %vm251_vm3, %v363_v45 }
 0x223   : > { %364 = vst.msk [vmem:[#allocation9] sm:$0xff] %vm251_vm3, %v360_v48  ;;  %366 = vst.msk [vmem:[#allocation9 + $0x10] sm:$0xff] %vm251_vm3, %v362_v49  ;;  %v1215_v50 = vpop.f32.mrb[2].mxu1  ;;  %v719_v48 = vld [vmem:[#allocation5 + $0x8] sm:$0xff] }
 0x224   : > { %v456_v51 = vpop.f32.mrb[3].mxu1 }
 0x227   : > { %v1218_v52 = vpop.f32.mrb[4].mxu1 }
 0x228   : > { %v466_v53 = vpop.f32.mrb[5].mxu1 }
 0x229   : > { %v375_v54 = vld [vmem:[#allocation9 + $0x8] sm:$0xff]  ;;  %v502_v55 = vld [vmem:[#allocation9 + $0x18] sm:$0xff] }
 0x22a   : > { %v462_v56 = vadd.f32 %v1215_v50, %v375_v54  ;;  %v374_v57 = vld [vmem:[#allocation9] sm:$0xff]  ;;  %520 = vperm.xlu0 %1279, %v502_v55   ;;  %v472_v58 = vadd.f32 %v1218_v52, %v502_v55  ;;  %510 = vperm.xlu1 %1280, %v375_v54   ;;  %v376_v59 = vld [vmem:[#allocation9 + $0x10] sm:$0xff]  ;;  %v720_v52 = vld [vmem:[#allocation5 + $0x10] sm:$0xff] }
 0x22b   : > { %v457_v60 = vadd.f32 %v456_v51, %v374_v57  ;;  %v467_v61 = vadd.f32 %v466_v53, %v376_v59  ;;  %v721_v51 = vld [vmem:[#allocation5 + $0x18] sm:$0xff] }
 0x22c   : > { %v476_v62 = vmul.f32 0.5, %v462_v56  ;;  %v478_v63 = vmul.f32 0.5, %v472_v58 }
 0x22d   : > { %v475_v0 = vmul.f32 0.5, %v457_v60  ;;  %v477_v1 = vmul.f32 0.5, %v467_v61 }
 0x22e   : > { %v480_v2 = vmax.f32 %v462_v56, %v476_v62  ;;  %v482_v3 = vmax.f32 %v472_v58, %v478_v63  ;;  %515 = vperm.xlu1 %1280, %v376_v59   ;;  %505 = vperm.xlu0 %1279, %v374_v57   ;;  %v718_v57 = vld [vmem:[#allocation5] sm:$0xff]  ;;  %v740_v63 = vld [vmem:[#allocation6 + $0x8] sm:$0xff] }
 0x22f   : > { %v479_v4 = vmax.f32 %v457_v60, %v475_v0  ;;  %v481_v5 = vmax.f32 %v467_v61, %v477_v1  ;;  %v739_v58 = vld [vmem:[#allocation6] sm:$0xff]  ;;  %v741_v0 = vld [vmem:[#allocation6 + $0x10] sm:$0xff] }
 0x230   : > { %484 = vst.msk [vmem:[#allocation7 + $0x8] sm:$0xff] %vm251_vm3, %v480_v2  ;;  %486 = vst.msk [vmem:[#allocation7 + $0x18] sm:$0xff] %vm251_vm3, %v482_v3 }
 0x231   : > { %483 = vst.msk [vmem:[#allocation7] sm:$0xff] %vm251_vm3, %v479_v4  ;;  %485 = vst.msk [vmem:[#allocation7 + $0x10] sm:$0xff] %vm251_vm3, %v481_v5  ;;  %v742_v5 = vld [vmem:[#allocation6 + $0x18] sm:$0xff] }
 0x237   : > { %v630_v6 = vld [vmem:[#allocation7 + $0x8] sm:$0xff]  ;;  %v632_v8 = vld [vmem:[#allocation7 + $0x18] sm:$0xff] }
 0x238   : > { %640 = vperm.xlu0 %1279, %v630_v6   ;;  %v629_v7 = vld [vmem:[#allocation7] sm:$0xff]  ;;  %v631_v9 = vld [vmem:[#allocation7 + $0x10] sm:$0xff] }
 0x239   : > { %635 = vperm.xlu1 %1280, %v629_v7  }
 0x23c   : > { %650 = vperm.xlu0 %1279, %v632_v8  }
 0x23d   : > { %645 = vperm.xlu1 %1280, %v631_v9  }
 0x2a7   : > { %v1223_v10 = vpop.f32.mrb[2].mxu0 }
 0x2a8   : > { %v602_v11 = vpop.f32.mrb[3].mxu0 }
 0x2a9   : > { %v521_v12 = vpop.permute.xlu0 %520  ;;  %v511_v13 = vpop.permute.xlu1 %510 }
 0x2aa   : > { %v608_v16 = vadd.f32 %v1223_v10, %v511_v13 }
 0x2ab   : > { %v1226_v14 = vpop.f32.mrb[4].mxu0 }
 0x2ac   : > { %v612_v15 = vpop.f32.mrb[5].mxu0  ;;  %v622_v21 = vmul.f32 0.5, %v608_v16  ;;  %v618_v22 = vadd.f32 %v1226_v14, %v521_v12 }
 0x2ad   : > { %v506_v17 = vpop.permute.xlu0 %505  ;;  %v516_v19 = vpop.permute.xlu1 %515 }
 0x2ae   : > { %v603_v20 = vadd.f32 %v602_v11, %v506_v17  ;;  %v613_v23 = vadd.f32 %v612_v15, %v516_v19  ;;  %v624_v26 = vmul.f32 0.5, %v618_v22  ;;  %v626_v27 = vmax.f32 %v608_v16, %v622_v21 }
 0x2b0   : > { %v621_v25 = vmul.f32 0.5, %v603_v20  ;;  %v623_v28 = vmul.f32 0.5, %v613_v23  ;;  %v628_v34 = vmax.f32 %v618_v22, %v624_v26 }
 0x2b2   : > { %v625_v32 = vmax.f32 %v603_v20, %v621_v25  ;;  %v627_v37 = vmax.f32 %v613_v23, %v623_v28 }
 0x2b7   : > { %v641_v29 = vpop.permute.xlu0 %640 }
 0x2b8   : > { %v654_v30 = vsub.f32 %v626_v27, %v641_v29  ;;  %v636_v31 = vpop.permute.xlu1 %635 }
 0x2b9   : > { %v653_v35 = vsub.f32 %v625_v32, %v636_v31 }
 0x2ba   : > { %v715_v33 = vsel %vm711_vm4, %v654_v30, 0.0 }
 0x2bb   : > { %724 = vadd.xlane.f32.xlu0 %v715_v33  ;;  %v651_v36 = vpop.permute.xlu0 %650  ;;  %v714_v43 = vsel %vm711_vm4, %v653_v35, 0.0  ;;  %v744_v45 = vmul.f32 %v715_v33, %v715_v33 }
 0x2bc   : > { %v656_v38 = vsub.f32 %v628_v34, %v651_v36  ;;  %v646_v39 = vpop.permute.xlu1 %645  ;;  %v743_v44 = vmul.f32 %v714_v43, %v714_v43 }
 0x2bd   : > { %v655_v40 = vsub.f32 %v627_v37, %v646_v39 }
 0x2be   : > { %v717_v41 = vsel %vm711_vm4, %v656_v38, 0.0 }
 0x2bf   : > { %728 = vadd.xlane.f32.xlu1 %v717_v41  ;;  %v716_v42 = vsel %vm711_vm4, %v655_v40, 0.0  ;;  %v746_v47 = vmul.f32 %v717_v41, %v717_v41 }
 0x2c0   : > { %726 = vadd.xlane.f32.xlu0 %v716_v42  ;;  %v745_v46 = vmul.f32 %v716_v42, %v716_v42 }
 0x2c3   : > { %722 = vadd.xlane.f32.xlu1 %v714_v43 }
 0x2c4   : > { %747 = vadd.xlane.f32.xlu0 %v743_v44 }
 0x2c7   : > { %749 = vadd.xlane.f32.xlu1 %v744_v45 }
 0x2c8   : > { %751 = vadd.xlane.f32.xlu0 %v745_v46 }
 0x2cb   : > { %753 = vadd.xlane.f32.xlu1 %v746_v47 }
 0x348   : > { %v725_v49 = vpop.xlane.xlu0 %724 }
 0x349   : > { %v731_v50 = vadd.f32 %v725_v49, %v719_v48 }
 0x34b   : > { %736 = vst.msk [vmem:[#allocation5 + $0x8] sm:$0xff] %vm251_vm3, %v731_v50 }
 0x34c   : > { %v729_v53 = vpop.xlane.xlu1 %728 }
 0x34d   : > { %v733_v54 = vadd.f32 %v729_v53, %v721_v51  ;;  %v727_v55 = vpop.xlane.xlu0 %726 }
 0x34e   : > { %v732_v56 = vadd.f32 %v727_v55, %v720_v52 }
 0x34f   : > { %738 = vst.msk [vmem:[#allocation5 + $0x18] sm:$0xff] %vm251_vm3, %v733_v54 }
 0x350   : > { %737 = vst.msk [vmem:[#allocation5 + $0x10] sm:$0xff] %vm251_vm3, %v732_v56  ;;  %v723_v59 = vpop.xlane.xlu1 %722 }
 0x351   : > { %v730_v60 = vadd.f32 %v723_v59, %v718_v57  ;;  %v748_v61 = vpop.xlane.xlu0 %747 }
 0x352   : > { %v755_v62 = vadd.f32 %v748_v61, %v739_v58 }
 0x353   : > { %735 = vst.msk [vmem:[#allocation5] sm:$0xff] %vm251_vm3, %v730_v60 }
 0x354   : > { %759 = vst.msk [vmem:[#allocation6] sm:$0xff] %vm251_vm3, %v755_v62  ;;  %v750_v1 = vpop.xlane.xlu1 %749 }
 0x355   : > { %v756_v2 = vadd.f32 %v750_v1, %v740_v63  ;;  %v752_v3 = vpop.xlane.xlu0 %751 }
 0x356   : > { %v757_v4 = vadd.f32 %v752_v3, %v741_v0 }
 0x357   : > { %760 = vst.msk [vmem:[#allocation6 + $0x8] sm:$0xff] %vm251_vm3, %v756_v2 }
 0x358   : > { %761 = vst.msk [vmem:[#allocation6 + $0x10] sm:$0xff] %vm251_vm3, %v757_v4  ;;  %v754_v6 = vpop.xlane.xlu1 %753 }
 0x359   : > { %v758_v7 = vadd.f32 %v754_v6, %v742_v5 }
 0x35b   : > { %762 = vst.msk [vmem:[#allocation6 + $0x18] sm:$0xff] %vm251_vm3, %v758_v7 }
 0x35c PF: > { %p1173_p6 = scmp.ne.s32.totalorder %s1341_s12, 2 }
 0x35d   : > { %v771_v8 = vld [vmem:[#allocation5] sm:$0xff] (!%p1173_p6)  ;;  %v773_v10 = vld [vmem:[#allocation5 + $0x10] sm:$0xff] (!%p1173_p6)  ;;  %v772_v15 = vld [vmem:[#allocation5 + $0x8] sm:$0xff] (!%p1173_p6)  ;;  %v1354_v17 = vmov (!%p1173_p6), 0   ;;  %s1355_s10 = smov (!%p1173_p6), 1   ;;  %vm925_vm5 = vcmask (!%p1173_p6), 64512  }
 0x35e   : > { %766 = sbr.rel (%p1173_p6) target bundleno = 1540 (0x604), region = 68  ;;  %v787_v9 = vld [vmem:[#allocation6] sm:$0xff] (!%p1173_p6)  ;;  %v1480_v11 = vmul.f32 (!%p1173_p6), 0.0625, %v771_v8  ;;  %v1482_v13 = vmul.f32 (!%p1173_p6), 0.0625, %v773_v10  ;;  %v788_v16 = vld [vmem:[#allocation6 + $0x8] sm:$0xff] (!%p1173_p6)  ;;  %1283 = vset.pattern.permute.xlu0 (!%p1173_p6), %v1354_v17  ;;  %1284 = vset.pattern.permute.xlu1 (!%p1173_p6), %v1354_v17  ;;  %v1484_v19 = vmul.f32 (!%p1173_p6), 0.0625, %v772_v15 }
 0x35f   : > { %v791_v12 = vmul.f32 (!%p1173_p6), 0.0625, %v787_v9  ;;  %v789_v14 = vld [vmem:[#allocation6 + $0x10] sm:$0xff] (!%p1173_p6)  ;;  %v792_v20 = vmul.f32 (!%p1173_p6), 0.0625, %v788_v16  ;;  %v774_v21 = vld [vmem:[#allocation5 + $0x18] sm:$0xff] (!%p1173_p6)  ;;  %v890_v45 = vld [vmem:[#allocation8] sm:$0xff] (!%p1173_p6)  ;;  %s1356_s25 = smov (!%p1173_p6), 127  }
 0x360   : > { %v793_v18 = vmul.f32 (!%p1173_p6), 0.0625, %v789_v14  ;;  %v795_v23 = vmul.f32 (!%p1173_p6), %v1480_v11, %v1480_v11  ;;  %v797_v24 = vmul.f32 (!%p1173_p6), %v1482_v13, %v1482_v13  ;;  %v1490_v25 = vmul.f32 (!%p1173_p6), 0.0625, %v774_v21  ;;  %v897_v46 = vld [vmem:[%s1580_s1] sm:$0xff] (!%p1173_p6)  ;;  %v899_v47 = vld [vmem:[%s1580_s1 + $0x10] sm:$0xff] (!%p1173_p6)  ;;  %v808_v54 = vld [vmem:[%s1581_s2 + $0x8] sm:$0xff] (!%p1173_p6)  ;;  %s1357_s7 = smov (!%p1173_p6), 2  }
 0x361   : > { %v796_v27 = vmul.f32 (!%p1173_p6), %v1484_v19, %v1484_v19  ;;  %1229 = vmatprep.mubr.msk.f32.mxu0 (!%p1173_p6), %vm925_vm5, %v897_v46  ;;  %1232 = vmatprep.mubr.msk.f32.mxu1 (!%p1173_p6), %vm925_vm5, %v899_v47  ;;  %v807_v48 = vld [vmem:[%s1581_s2] sm:$0xff] (!%p1173_p6)  ;;  %v809_v49 = vld [vmem:[%s1581_s2 + $0x10] sm:$0xff] (!%p1173_p6)  ;;  %v810_v56 = vld [vmem:[%s1581_s2 + $0x18] sm:$0xff] (!%p1173_p6)  ;;  %vm855_vm6 = vcmask (!%p1173_p6), 7168   ;;  %vm887_vm7 = vcmask (!%p1173_p6), 0  }
 0x362   : > { %v790_v22 = vld [vmem:[#allocation6 + $0x18] sm:$0xff] (!%p1173_p6)  ;;  %v799_v28 = vsub.f32 (!%p1173_p6), %v791_v12, %v795_v23  ;;  %v801_v29 = vsub.f32 (!%p1173_p6), %v793_v18, %v797_v24  ;;  %v798_v30 = vmul.f32 (!%p1173_p6), %v1490_v25, %v1490_v25  ;;  %v889_v60 = vld [vmem:[%s1579_s0] sm:$0xff] (!%p1173_p6)  ;;  %v898_v63 = vld [vmem:[%s1580_s1 + $0x8] sm:$0xff] (!%p1173_p6) }
 0x363   : > { %v794_v26 = vmul.f32 (!%p1173_p6), 0.0625, %v790_v22  ;;  %v800_v31 = vsub.f32 (!%p1173_p6), %v792_v20, %v796_v27  ;;  %v900_v0 = vld [vmem:[%s1580_s1 + $0x18] sm:$0xff] (!%p1173_p6)  ;;  %v780_v2 = vld [vmem:[#allocation7 + $0x8] sm:$0xff] (!%p1173_p6)  ;;  %v781_v3 = vld [vmem:[#allocation7 + $0x10] sm:$0xff] (!%p1173_p6) }
 0x364   : > { %v803_v32 = vmax.f32 (!%p1173_p6), %v799_v28, 0.0  ;;  %v805_v33 = vmax.f32 (!%p1173_p6), %v801_v29, 0.0  ;;  %v779_v1 = vld [vmem:[#allocation7] sm:$0xff] (!%p1173_p6)  ;;  %v784_v6 = vadd.f32 (!%p1173_p6), %v780_v2, %v1484_v19  ;;  %v785_v7 = vadd.f32 (!%p1173_p6), %v781_v3, %v1482_v13  ;;  %v782_v9 = vld [vmem:[#allocation7 + $0x18] sm:$0xff] (!%p1173_p6) }
 0x365   : > { %v802_v34 = vsub.f32 %v794_v26, %v798_v30  ;;  %v804_v35 = vmax.f32 %v800_v31, 0.0  ;;  %v783_v4 = vadd.f32 %v779_v1, %v1480_v11  ;;  %v786_v16 = vadd.f32 %v782_v9, %v1490_v25  ;;  %v901_v30 = vld [vmem:[#allocation9] sm:$0xff]  ;;  %v903_v31 = vld [vmem:[#allocation9 + $0x10] sm:$0xff] }
 0x366   : > { %v811_v36 = vadd.f32 1e-05, %v803_v32  ;;  %v813_v37 = vadd.f32 1e-05, %v805_v33 }
 0x367   : > { %v806_v38 = vmax.f32 %v802_v34, 0.0  ;;  %v812_v39 = vadd.f32 1e-05, %v804_v35 }
 0x368   : > { %1285 = vrsqrt.f32 %v811_v36 }
 0x369   : > { %v814_v40 = vadd.f32 1e-05, %v806_v38  ;;  %1287 = vrsqrt.f32 %v813_v37  ;;  %v860_v38 = vld [vmem:[%s1581_s2] sm:$0x1] }
 0x36a   : > { %1289 = vrsqrt.f32 %v812_v39 }
 0x36b   : > { %1291 = vrsqrt.f32 %v814_v40 }
 0x372   : > { %v1286_v41 = vpop.eup %1285 }
 0x373   : > { %v1288_v42 = vpop.eup %1287  ;;  %823 = vrot.lane.b32.xlu0 %v1286_v41, %s1355_s10  ;;  %v902_v41 = vld [vmem:[#allocation9 + $0x8] sm:$0xff] }
 0x374   : > { %v1290_v43 = vpop.eup %1289  ;;  %827 = vrot.lane.b32.xlu1 %v1288_v42, %s1355_s10  ;;  %v904_v42 = vld [vmem:[#allocation9 + $0x18] sm:$0xff] }
 0x375   : > { %v1292_v44 = vpop.eup %1291 }
 0x377   : > { %825 = vrot.lane.b32.xlu0 %v1290_v43, %s1355_s10 }
 0x378   : > { %829 = vrot.lane.b32.xlu1 %v1292_v44, %s1355_s10  ;;  %s1358_s10 = smov 126  }
 0x37b   : > { %893 = vperm.xlu0 %1283, %v890_v45  }
 0x3e5   : > { %v824_v50 = vpop.permute.xlu0 %823 }
 0x3e6   : > { %v835_v51 = vmul.f32 %v824_v50, %v807_v48  ;;  %v828_v52 = vpop.permute.xlu1 %827 }
 0x3e7   : > { %v837_v53 = vmul.f32 %v828_v52, %v809_v49 }
 0x3e8   : > { %843 = vrot.lane.b32.xlu1 %v835_v51, %s1356_s25 }
 0x3e9   : > { %v826_v55 = vpop.permute.xlu0 %825  ;;  %847 = vrot.lane.b32.xlu0 %v837_v53, %s1356_s25 }
 0x3ea   : > { %v836_v57 = vmul.f32 %v826_v55, %v808_v54  ;;  %v830_v58 = vpop.permute.xlu1 %829 }
 0x3eb   : > { %v838_v59 = vmul.f32 %v830_v58, %v810_v56 }
 0x3ec   : > { %845 = vrot.lane.b32.xlu1 %v836_v57, %s1356_s25 }
 0x3f0   : > { %849 = vrot.lane.b32.xlu1 %v838_v59, %s1356_s25 }
 0x3fa   : > { %v894_v61 = vpop.permute.xlu0 %893 }
 0x3fb   : > { %v896_v62 = vmul.f32 %v894_v61, %v889_v60 }
 0x3fd   : > { %1227 = vmatprep.subr.mxu0 %v896_v62  ;;  %1237 = vmatprep.subr.mxu1 %v896_v62 }
 0x3fe   : > { %1228 = vmatpush3.msra.mxu0 %v896_v62  ;;  %1238 = vmatpush3.msra.mxu1 %v896_v62 }
 0x3ff   : > { %1230 = vmatmul.mubr.msk.f32.vlgmr.msra.gmra.mrb[0].mxu0 %vm925_vm5, %v898_v63  ;;  %1233 = vmatmul.mubr.msk.f32.vlgmr.msra.gmra.mrb[0].mxu1 %vm925_vm5, %v900_v0 }
 0x45a   : > { %v844_v5 = vpop.permute.xlu1 %843 }
 0x45b   : > { %856 = vst.msk [vmem:[#allocation10] sm:$0xff] %vm855_vm6, %v844_v5  ;;  %v848_v8 = vpop.permute.xlu0 %847  ;;  %v861_v10 = vmul.f32 %v844_v5, %v783_v4 }
 0x45c   : > { %858 = vst.msk [vmem:[#allocation10 + $0x10] sm:$0xff] %vm855_vm6, %v848_v8  ;;  %v863_v15 = vmul.f32 %v848_v8, %v785_v7 }
 0x45d   : > { %v865_v11 = vsel %vm855_vm6, %v861_v10, 0.0 }
 0x45e   : > { %v846_v12 = vpop.permute.xlu1 %845  ;;  %v868_v13 = vsel %vm855_vm6, %v863_v15, 0.0  ;;  %v1074_v15 = vlaneseq }
 0x45f   : > { %857 = vst.msk [vmem:[#allocation10 + $0x8] sm:$0xff] %vm855_vm6, %v846_v12  ;;  %v862_v14 = vmul.f32 %v846_v12, %v784_v6 }
 0x461   : > { %v866_v17 = vsel %vm855_vm6, %v862_v14, 0.0 }
 0x462   : > { %v867_v18 = vadd.f32 %v866_v17, %v865_v11  ;;  %v850_v19 = vpop.permute.xlu1 %849  ;;  %v1031_v32 = vld [vmem:[#allocation10] sm:$0xff]  ;;  %v1075_v11 = vshrl.u32 %v1074_v15, 7 }
 0x463   : > { %859 = vst.msk [vmem:[#allocation10 + $0x18] sm:$0xff] %vm855_vm6, %v850_v19  ;;  %v864_v20 = vmul.f32 %v850_v19, %v786_v16  ;;  %v1033_v33 = vld [vmem:[#allocation10 + $0x10] sm:$0xff] }
 0x464   : > { %v869_v21 = vadd.f32 %v868_v13, %v867_v18  ;;  %v1076_v18 = vsub.s32 0, %v1075_v11 }
 0x465   : > { %v870_v22 = vsel %vm855_vm6, %v864_v20, 0.0 }
 0x466   : > { %v871_v23 = vadd.f32 %v870_v22, %v869_v21  ;;  %v1032_v43 = vld [vmem:[#allocation10 + $0x8] sm:$0xff] }
 0x468   : > { %v872_v24 = vrot.slane %v871_v23, 4 }
 0x46a   : > { %v873_v26 = vadd.f32 %v872_v24, %v871_v23  ;;  %v1034_v44 = vld [vmem:[#allocation10 + $0x18] sm:$0xff] }
 0x46c   : > { %v874_v27 = vrot.slane %v873_v26, 2 }
 0x46e   : > { %v875_v28 = vadd.f32 %v874_v27, %v873_v26  ;;  %v1086_v26 = vand.u32 127, %v1074_v15 }
 0x470   : > { %v876_v25 = vrot.slane %v875_v28, 1  ;;  %vm1090_vm8 = vcmp.lt.s32.totalorder %v1086_v26, 16 }
 0x472   : > { %v877_v29 = vadd.f32 %v876_v25, %v875_v28 }
 0x474   : > { %879 = vrot.lane.b32.xlu0 %v877_v29, %s1357_s7 }
 0x478   : > { %907 = vperm.xlu0 %1283, %v901_v30  }
 0x47c   : > { %917 = vperm.xlu0 %1283, %v903_v31  }
 0x480   : > { %1037 = vperm.xlu0 %1283, %v1031_v32  }
 0x484   : > { %1047 = vperm.xlu0 %1283, %v1033_v33  }
 0x4d2   : > { %v1231_v34 = vpop.f32.mrb[0].mxu0  ;;  %v1234_v35 = vpop.f32.mrb[0].mxu1 }
 0x4d3   : > { %v1004_v36 = vpop.f32.mrb[1].mxu0  ;;  %v1014_v37 = vpop.f32.mrb[1].mxu1 }
 0x4e6   : > { %v880_v39 = vpop.permute.xlu0 %879 }
 0x4e7   : > { %v882_v40 = vsub.f32 %v860_v38, %v880_v39 }
 0x4e9   : > { %884 = vrot.lane.b32.xlu1 %v882_v40, %s1358_s10 }
 0x4ed   : > { %912 = vperm.xlu1 %1284, %v902_v41  }
 0x4f1   : > { %922 = vperm.xlu1 %1284, %v904_v42  }
 0x4f5   : > { %1042 = vperm.xlu1 %1284, %v1032_v43  }
 0x4f7   : > { %v908_v46 = vpop.permute.xlu0 %907 }
 0x4f8   : > { %v1005_v49 = vadd.f32 %v1004_v36, %v908_v46 }
 0x4f9   : > { %1052 = vperm.xlu1 %1284, %v1034_v44  }
 0x4fa   : > { %v1023_v54 = vmul.f32 0.5, %v1005_v49 }
 0x4fb   : > { %v918_v48 = vpop.permute.xlu0 %917 }
 0x4fc   : > { %v1015_v51 = vadd.f32 %v1014_v37, %v918_v48  ;;  %v1027_v60 = vmax.f32 %v1005_v49, %v1023_v54 }
 0x4fe   : > { %v1025_v57 = vmul.f32 0.5, %v1015_v51 }
 0x4ff   : > { %v1038_v53 = vpop.permute.xlu0 %1037 }
 0x500   : > { %v1055_v0 = vmul.f32 %v1038_v53, %v1027_v60  ;;  %v1029_v1 = vmax.f32 %v1015_v51, %v1025_v57 }
 0x503   : > { %v1048_v62 = vpop.permute.xlu0 %1047 }
 0x504   : > { %v1057_v4 = vmul.f32 %v1048_v62, %v1029_v1 }
 0x55b   : > { %v885_v45 = vpop.permute.xlu1 %884 }
 0x55c   : > { %888 = vst.msk [vmem:[#allocation11] sm:$0x1] %vm887_vm7, %v885_v45 }
 0x563   : > { %v1068_v47 = vld [vmem:[#allocation11] sm:$0x1] }
 0x564   : > { %1071 = vperm.xlu0 %1283, %v1068_v47  }
 0x56c   : > { %v913_v50 = vpop.permute.xlu1 %912 }
 0x56d   : > { %v1010_v52 = vadd.f32 %v1231_v34, %v913_v50 }
 0x56f   : > { %v1024_v55 = vmul.f32 0.5, %v1010_v52 }
 0x570   : > { %v923_v56 = vpop.permute.xlu1 %922 }
 0x571   : > { %v1020_v58 = vadd.f32 %v1234_v35, %v923_v56  ;;  %v1028_v59 = vmax.f32 %v1010_v52, %v1024_v55 }
 0x573   : > { %v1026_v61 = vmul.f32 0.5, %v1020_v58 }
 0x574   : > { %v1043_v63 = vpop.permute.xlu1 %1042 }
 0x575   : > { %v1056_v2 = vmul.f32 %v1043_v63, %v1028_v59  ;;  %v1030_v3 = vmax.f32 %v1020_v58, %v1026_v61 }
 0x577   : > { %v1059_v5 = vadd.f32 %v1056_v2, %v1055_v0 }
 0x578   : > { %v1053_v6 = vpop.permute.xlu1 %1052 }
 0x579   : > { %v1058_v7 = vmul.f32 %v1053_v6, %v1030_v3  ;;  %v1060_v8 = vadd.f32 %v1059_v5, %v1057_v4 }
 0x57b   : > { %v1061_v9 = vadd.f32 %v1060_v8, %v1058_v7 }
 0x57d   : > { %v1062_v10 = vrot.slane %v1061_v9, 4 }
 0x57f   : > { %v1063_v12 = vadd.f32 %v1062_v10, %v1061_v9 }
 0x581   : > { %v1064_v14 = vrot.slane %v1063_v12, 2 }
 0x583   : > { %v1065_v16 = vadd.f32 %v1064_v14, %v1063_v12 }
 0x585   : > { %v1066_v17 = vrot.slane %v1065_v16, 1 }
 0x587   : > { %v1067_v13 = vadd.f32 %v1066_v17, %v1065_v16 }
 0x5e3   : > { %v1072_v19 = vpop.permute.xlu0 %1071 }
 0x5e4   : > { %v1077_v20 = vrot.slane %v1072_v19, %v1076_v18 }
 0x5e6   : > { %v1078_v21 = vadd.f32 %v1077_v20, %v1067_v13 }
 0x5e8   : > { %v1178_v22 = vmul.f32 -1.442695, %v1078_v21 }
 0x5ea   : > { %1293 = vpow2.f32 %v1178_v22 }
 0x5f4   : > { %v1294_v23 = vpop.eup %1293 }
 0x5f5   : > { %v1082_v24 = vadd.f32 1.0, %v1294_v23 }
 0x5f7   : > { %1295 = vrcp.f32 %v1082_v24 }
 0x601   : > { %v1296_v27 = vpop.eup %1295 }
 0x602   : > { %v1091_v28 = vsel %vm1090_vm8, %v1296_v27, 0.0 }
 0x603   : > { %1095 = vst [vmem:[#allocation12] sm:$0x1] %v1091_v28 }
 0x604 PF: > { %p1544_p7 = scmp.eq.s32.totalorder %s1155_s15, 2  ;;  %s1359_s12 = smov [#allocation12]  }
 0x605   : > { %s1103_s17 = sshll.u32 %s1359_s12, 4  ;;  %s1104_s17 = int_to_ptr.vmem [resolvable:$true] %s1103_s17 }
 0x606   : > { %s1297_s18 = scalar_lea.vmem %s1104_s17, 16  ;;  %s1303_s19 = scalar_lea.vmem %s1104_s17, 32 }
 0x607   : > { %p1298_p8 = scmp.ne.s32.totalorder %s1104_s17, %s1297_s18  ;;  %p1304_p11 = scmp.lt.s32.totalorder %s1104_s17, %s1104_s17 }
 0x608   : > { %p1305_p12 = scmp.lt.s32.totalorder %s1303_s19, %s1297_s18 }
 0x609   : > { %p1299_p9 = pnand %p1298_p8, %p1544_p7 }
 0x60a   : > { %p1306_p13 = por %p1305_p12, %p1304_p11 }
 0x60b   : > { %p1300_p10 = pneg %p1299_p9 }
 0x60d   : > { %p1307_p0 = pnand %p1306_p13, %p1300_p10 }
 0x60f   : > { %1310 = shalt.err (!%p1307_p0)
}
 0x610   : > { %s1311_s21 = scalar_lea.hbm %s1582_s3, 16 }
 0x611   : > { %p1312_p1 = scmp.ne.s32.totalorder %s1582_s3, %s1311_s21  ;;  %p1317_p4 = scmp.lt.u32.totalorder %s1311_s21, %s1582_s3 }
 0x613   : > { %p1313_p2 = pnand %p1312_p1, %p1544_p7 }
 0x615   : > { %p1314_p3 = pneg %p1313_p2 }
 0x617   : > { %p1319_p5 = pnand %p1317_p4, %p1314_p3 }
 0x619   : > { %1322 = shalt.err (!%p1319_p5)
}
 0x61a   : > { %1240 = dma.vmem_to_hbm [thread:$0]  (%p1544_p7), %s1104_s17, 16, %s1582_s3, [#allocation13]  }
 0x61b   : > { %1336 = dma.done.wait (%p1544_p7), [#allocation13], 16  }
 0x61c   : > { %1338 = vsyncadd (%p1544_p7), [#allocation13], 4294967280 }
 0x61d PF: > { %s14_s14 = sadd.s32 1, %s1349_s14   ;;  %s1584_s12 = smov %s1345_s13 }
 0x61e   : > { %p11_p6 = scmp.ge.s32.totalorder %s14_s14, 5   ;;  %s1585_s13 = smov %s1587_s16 }
 0x620   :  { %13 = sbr.rel (!%p11_p6) target bundleno = 2 (0x2), region = 100 }
 0x627   :  { %1116 = vsyncpa [#allocation13], 1 }
 0x628   :  { %1118 = vsyncpa [#allocation13 + $0x1], 1 }

</bundles_post_ra>
